<compile_context>
chip_gen: v7x
topology: tpu7x:2x2x1
jax: 0.10.0
libtpu: 0.0.40
codegen_flags: <defaults>
</compile_context>

<pallas_src>
import jax
import jax.numpy as jnp
from jax.experimental import pallas as pl
from jax.experimental.pallas import tpu as pltpu


# ----------------------------------------------------------------------------
# The module's forward: zero-cost identity (no kernel, no HBM traffic).
# ----------------------------------------------------------------------------
def identity_map(x: jax.Array, *args, **kwargs) -> jax.Array:
    """Pallas-project equivalent of IdentityMap.forward: return x unchanged."""
    return x


# Config property of the module (metadata only; no compute).
IDENTITY_MAP_CONFIG = {"mm_projector_type": "identity"}


# ----------------------------------------------------------------------------
# Optional materializing copy (only if a distinct output buffer is required).
# ----------------------------------------------------------------------------
def _copy_kernel(x_ref, o_ref):
    # Straight VMEM->VMEM copy of the current tile.
    o_ref[...] = x_ref[...]


def _pick_lane_dense_cols(n: int):
    """Largest C in {4096..128} that is a multiple of 128 and divides n."""
    for cand in (4096, 2048, 1024, 512, 256, 128):
        if n % cand == 0:
            return cand
    return None


def identity_copy(x: jax.Array, *, block_bytes: int = 4 << 20) -> jax.Array:
    """HBM-roofline copy of x into a fresh buffer via Pallas.

    Use identity_map() instead whenever aliasing the input is acceptable.
    """
    orig_shape = x.shape
    n = x.size
    itemsize = x.dtype.itemsize

    C = _pick_lane_dense_cols(n)
    if C is None:
        # Total size not a multiple of 128: copy the whole array as one block.
        # TODO(synk): for huge non-128-divisible inputs, pad/tile explicitly.
        return pl.pallas_call(
            _copy_kernel,
            out_shape=jax.ShapeDtypeStruct(orig_shape, x.dtype),
        )(x)

    R = n // C
    x2 = x.reshape(R, C)  # lane-dense 2-D view (pure metadata reshape)

    # Row-tile size targeting ~block_bytes per block, multiple of 8 sublanes.
    row_bytes = C * itemsize
    desired = max(8, (block_bytes // row_bytes) // 8 * 8)
    tr = min(R, desired)

    if tr >= R:
        # Tiny input: single full-array block, no grid -> no per-step overhead.
        out2 = pl.pallas_call(
            _copy_kernel,
            out_shape=jax.ShapeDtypeStruct((R, C), x.dtype),
        )(x2)
        return out2.reshape(orig_shape)

    grid = (pl.cdiv(R, tr),)
    out2 = pl.pallas_call(
        _copy_kernel,
        out_shape=jax.ShapeDtypeStruct((R, C), x.dtype),
        grid_spec=pltpu.PrefetchScalarGridSpec(
            num_scalar_prefetch=0,
            grid=grid,
            in_specs=[pl.BlockSpec((tr, C), lambda i: (i, 0))],
            out_specs=pl.BlockSpec((tr, C), lambda i: (i, 0)),
        ),
        compiler_params=pltpu.CompilerParams(
            dimension_semantics=("parallel",),  # lets v7x split across 2 TCs
            vmem_limit_bytes=32 << 20,          # safe on v5e/v6e/v7x
        ),
    )(x2)
    return out2.reshape(orig_shape)


if __name__ == "__main__":
    key = jax.random.PRNGKey(0)
    # Small shapes consistent with a projector input: batch=2, seq=8, hidden=32.
    x = jax.random.normal(key, (2, 8, 32), dtype=jnp.float32)

    # 1) True module semantics: zero-cost pass-through (no kernel launched).
    y = identity_map(x)
    jax.block_until_ready(y)
    assert y.shape == x.shape and y.dtype == x.dtype
    assert bool(jnp.array_equal(y, x))

    # 2) Materializing Pallas copy: tiny input -> single lane-dense block.
    y2 = identity_copy(x)
    jax.block_until_ready(y2)
    assert y2.shape == x.shape and y2.dtype == x.dtype
    assert bool(jnp.array_equal(y2, x))

    # 3) Exercise the row-tiled (gridded) lane-dense path on a slightly larger
    #    but still small input, forcing >1 grid step via a small block budget.
    x3 = jax.random.normal(jax.random.PRNGKey(0), (4, 64, 256), dtype=jnp.float32)
    y3 = identity_copy(x3, block_bytes=2048)
    jax.block_until_ready(y3)
    assert y3.shape == x3.shape and y3.dtype == x3.dtype
    assert bool(jnp.array_equal(y3, x3))

    print("KERNEL_OK")
</pallas_src>

<mosaic_0001>
module attributes {stable_mosaic.version = 11 : i64} {
  func.func @_copy_kernel(%arg0: memref<1x512xf32, #tpu.memory_space<vmem>>, %arg1: memref<1x512xf32, #tpu.memory_space<vmem>>) attributes {dimension_semantics = [], scalar_prefetch = 0 : i64, scratch_operands = 0 : i64, tpu.core_type = #tpu.core_type<tc>} {
    %c0 = arith.constant 0 : index
    %c0_0 = arith.constant 0 : index
    %0 = vector.load %arg0[%c0, %c0_0] : memref<1x512xf32, #tpu.memory_space<vmem>>, vector<1x512xf32>
    %c0_1 = arith.constant 0 : index
    %c0_2 = arith.constant 0 : index
    %1 = vector.load %arg1[%c0_1, %c0_2] : memref<1x512xf32, #tpu.memory_space<vmem>>, vector<1x512xf32>
    tpu.vector_store %arg1[%c0_1, %c0_2], %0 {strides = array<i32>} : memref<1x512xf32, #tpu.memory_space<vmem>>, vector<1x512xf32>,
    return
  }
}

</mosaic_0001>

<bundles_post_ra>
// kernel: tpu_custom_call.1
= control target key start
LH: loop header
LB: loop body
LE: loop exit
PB: predicated region body
PF: predicated region fallthrough
CT: control target
= control target key end

     0   :  { %6 = vsyncpa [#allocation3], 0  ;;  %s128_s0 = inlined_call_operand.hbm [shape: f32[1,512], index: 0, kind: input, shape index: {}]   ;;  %s129_s1 = inlined_call_operand.hbm [shape: f32[1,512], index: 1, kind: output, shape index: {}]  }
   0x1   :  { %7 = vsyncpa [#allocation4], 0  ;;  %s92_s6 = smov [#allocation2]   ;;  %s44_s10 = scalar_lea.hbm %s128_s0, 64 }
   0x2   :  { %s14_s7 = sshll.u32 %s92_s6, 4  ;;  %p45_p0 = scmp.ne.s32.totalorder %s128_s0, %s44_s10  ;;  %s15_s7 = int_to_ptr.vmem [resolvable:$true] %s14_s7 }
   0x3   :  { %p48_p1 = scmp.lt.u32.totalorder %s44_s10, %s128_s0 }
   0x5   :  { %p50_p2 = pnand %p48_p1, %p45_p0 }
   0x7   :  { %53 = shalt.err (!%p50_p2)
}
   0x8   :  { %s54_s15 = scalar_lea.vmem %s15_s7, 64  ;;  %p59_p4 = scmp.lt.s32.totalorder %s15_s7, %s15_s7 }
   0x9   :  { %p55_p3 = scmp.ne.s32.totalorder %s15_s7, %s54_s15  ;;  %p60_p5 = scmp.lt.s32.totalorder %s54_s15, %s54_s15 }
   0xb   :  { %p61_p6 = por %p60_p5, %p59_p4 }
   0xd   :  { %p62_p7 = pnand %p61_p6, %p55_p3 }
   0xf   :  { %65 = shalt.err (!%p62_p7)
}
  0x10   :  { %17 = dma.hbm_to_vmem [thread:$0]  %s128_s0, 64, %s15_s7, [#allocation3]  }
  0x11   :  { %88 = dma.done.wait [#allocation3], 64  }
  0x12   :  { %89 = vsyncadd [#allocation3], 4294967232  ;;  %v22_v0 = vlaneseq  ;;  %s93_s18 = smov [#allocation5]   ;;  %v21_v1 = vld [vmem:[#allocation2] sm:$0xf] }
  0x13   :  { %s33_s19 = sshll.u32 %s93_s18, 4  ;;  %s34_s19 = int_to_ptr.vmem [resolvable:$true] %s33_s19 }
  0x14   :  { %vm24_vm0 = vcmp.lt.s32.totalorder %v22_v0, 512  ;;  %s66_s20 = scalar_lea.vmem %s34_s19, 64  ;;  %p71_p9 = scmp.lt.s32.totalorder %s34_s19, %s34_s19 }
  0x15   :  { %26 = vst.msk [vmem:[#allocation5] sm:$0xf] %vm24_vm0, %v21_v1  ;;  %p67_p8 = scmp.ne.s32.totalorder %s34_s19, %s66_s20  ;;  %p72_p10 = scmp.lt.s32.totalorder %s66_s20, %s66_s20 }
  0x17   :  { %p73_p11 = por %p72_p10, %p71_p9 }
  0x19   :  { %p74_p12 = pnand %p73_p11, %p67_p8 }
  0x1b   :  { %77 = shalt.err (!%p74_p12)
}
  0x1c   :  { %s78_s0 = scalar_lea.hbm %s129_s1, 64 }
  0x1d   :  { %p79_p13 = scmp.ne.s32.totalorder %s129_s1, %s78_s0  ;;  %p82_p0 = scmp.lt.u32.totalorder %s78_s0, %s129_s1 }
  0x1f   :  { %p84_p1 = pnand %p82_p0, %p79_p13 }
  0x21   :  { %87 = shalt.err (!%p84_p1)
}
  0x22   :  { %36 = dma.vmem_to_hbm [thread:$0]  %s34_s19, 64, %s129_s1, [#allocation4]  }
  0x23   :  { %90 = dma.done.wait [#allocation4], 64  }
  0x24   :  { %91 = vsyncadd [#allocation4], 4294967232 }
  0x25   :  { %40 = vsyncpa [#allocation3], 1 }
  0x26   :  { %41 = vsyncpa [#allocation4], 1 }

</bundles_post_ra>
